<compile_context>
chip_gen: v6e
topology: v6e:2x2x1
jax: 0.10.0
libtpu: 0.0.40
codegen_flags: <defaults>
</compile_context>

<pallas_src>
import jax
import jax.numpy as jnp
import numpy as np
from jax.experimental import pallas as pl
from jax.experimental.pallas import tpu as pltpu

# ---------------- problem sizes ----------------
B = 2          # batch
N = 8          # sequence length
C = 32         # dim
H = 4          # num_heads
HD = C // H    # head_dim
MLP_RATIO = 4.0
HID = int(C * MLP_RATIO)
SCALE = HD ** (-0.5)
LN_EPS = 1e-5
INV_SQRT2 = 0.7071067811865476
SQRT_2_OVER_PI = 0.7978845608028654

G = H * B           # number of independent (head, batch) attention groups
GN = G * N          # stacked attention rows (64)
NB = C // HD        # lane blocks of width HD per merged row (4)
R = B * N           # token rows (16)
assert GN == R * NB and C % HD == 0 and HID <= 128 and C <= 128


# ---------------- single fused kernel ----------------
def decoder_kernel(kv_ref, x_ref, wp_ref, w1_ref, w2_ref, vec_ref,
                   amask_ref, amat_ref, bmask_ref, o_ref):
    f32, bf16 = jnp.float32, jnp.bfloat16

    x2 = x_ref[...]           # (R, C) f32 : q source + residual
    kv2 = kv_ref[...]         # (R, C) f32 : k = v
    vecs = vec_ref[...]       # (8, 128) packed f32 vectors
    pb = vecs[0:1, 0:C]       # proj bias        (1, C)
    g_row = vecs[1:2, 0:C]    # LayerNorm gamma  (1, C)
    be_row = vecs[2:3, 0:C]   # LayerNorm beta   (1, C)
    b2_row = vecs[3:4, 0:C]   # fc2 bias         (1, C)
    b1_row = vecs[4:5, 0:HID]  # fc1 bias        (1, HID)

    # ---- head split: (R, C) -> (G*N, HD), rows ordered (head, batch, seq) ----
    qs = jnp.concatenate([x2[:, h * HD:(h + 1) * HD] for h in range(H)],
                         axis=0).astype(bf16)                         # (GN, HD)
    ks = jnp.concatenate([kv2[:, h * HD:(h + 1) * HD] for h in range(H)],
                         axis=0).astype(bf16)                         # (GN, HD)

    # ---- attention: one score matmul + block-diagonal mask + 64-lane softmax ----
    s = jax.lax.dot_general(qs, ks, (((1,), (1,)), ((), ())),
                            preferred_element_type=f32) * SCALE       # (GN, GN)
    s = s + amask_ref[...]                 # mask BEFORE max-subtraction
    s = s - jnp.max(s, axis=-1, keepdims=True)
    e = jnp.exp(s)
    p = e * pl.reciprocal(jnp.sum(e, axis=-1, keepdims=True), approx=True)

    o = jnp.dot(p.astype(bf16), ks, preferred_element_type=f32)       # (GN, HD), v = k

    # ---- quirky torch merge (== o.reshape(R, C)) via lane-tile * mask + 0/1 matmul ----
    opad = (jnp.concatenate([o] * NB, axis=1) * bmask_ref[...]).astype(bf16)  # (GN, C)
    merged = jnp.dot(amat_ref[...], opad, preferred_element_type=f32)         # (R, C)

    # ---- output projection ----
    y = jnp.dot(merged.astype(bf16), wp_ref[...],
                preferred_element_type=f32) + pb                      # (R, C)

    # ---- first residual ----
    x1 = x2 + y

    # ---- LayerNorm (norm2), f32 ----
    mu = jnp.mean(x1, axis=-1, keepdims=True)
    var = jnp.mean(jnp.square(x1 - mu), axis=-1, keepdims=True)
    xn = (x1 - mu) * jax.lax.rsqrt(var + LN_EPS) * g_row + be_row

    # ---- MLP: fc1 -> GELU(tanh approx, EUP) -> fc2 ----
    h1 = jnp.dot(xn.astype(bf16), w1_ref[...],
                 preferred_element_type=f32) + b1_row                 # (R, HID)
    h1 = 0.5 * h1 * (1.0 + jnp.tanh(SQRT_2_OVER_PI *
                                    (h1 + 0.044715 * h1 * h1 * h1)))
    m = jnp.dot(h1.astype(bf16), w2_ref[...],
                preferred_element_type=f32) + b2_row                  # (R, C)

    # ---- second residual, one contiguous (R, C) store ----
    o_ref[...] = (x1 + m).astype(o_ref.dtype)


# ---------------- wrapper ----------------
def _full_spec(shape):
    return pl.BlockSpec(shape, lambda i, _s=shape: (0,) * len(_s))


@jax.jit
def decoder_trans(kv, x, wpT, w1t, w2t, vecs, amask, amat, bmask):
    kv2 = kv.reshape(R, C)      # free bitcast-style reshapes outside the kernel
    x2 = x.reshape(R, C)
    out2 = pl.pallas_call(
        decoder_kernel,
        out_shape=jax.ShapeDtypeStruct((R, C), jnp.float32),
        grid=(1,),
        in_specs=[
            _full_spec((R, C)),        # kv
            _full_spec((R, C)),        # x
            _full_spec((C, C)),        # proj_w^T, bf16
            _full_spec((C, HID)),      # fc1_w^T, bf16
            _full_spec((HID, C)),      # fc2_w^T, bf16
            _full_spec((8, 128)),      # packed bias/scale vectors, f32
            _full_spec((GN, GN)),      # additive block-diag attention mask, f32
            _full_spec((R, GN)),       # 0/1 row-collapse matrix A, bf16
            _full_spec((GN, C)),       # 0/1 lane-block mask, f32
        ],
        out_specs=_full_spec((R, C)),
        compiler_params=pltpu.CompilerParams(
            dimension_semantics=("arbitrary",)),
    )(kv2, x2, wpT, w1t, w2t, vecs, amask, amat, bmask)
    return out2.reshape(B, N, C)


def prepare_params(p):
    """Run ONCE outside jit: pre-transpose weights (bf16), pack the five small
    bias/scale vectors into one lane-dense (8,128) slab, and build the constant
    attention mask / merge-selection matrices."""
    bf16 = jnp.bfloat16
    wpT = jnp.asarray(p["proj_w"]).T.astype(bf16)      # (C, C)
    w1t = jnp.asarray(p["fc1_w"]).T.astype(bf16)       # (C, HID)
    w2t = jnp.asarray(p["fc2_w"]).T.astype(bf16)       # (HID, C)

    vecs = jnp.zeros((8, 128), jnp.float32)
    vecs = vecs.at[0, :C].set(p["proj_b"])
    vecs = vecs.at[1, :C].set(p["ln2_w"])
    vecs = vecs.at[2, :C].set(p["ln2_b"])
    vecs = vecs.at[3, :C].set(p["fc2_b"])
    vecs = vecs.at[4, :HID].set(p["fc1_b"])

    ro = np.arange(GN)
    # additive mask: 0 inside each (head,batch) 8x8 diagonal block, -1e9 elsewhere
    amask = jnp.asarray(
        np.where(ro[:, None] // N == ro[None, :] // N, 0.0, -1e9), jnp.float32)
    # A[r_m, r_o] = 1 iff r_o // NB == r_m  (collapses NB stacked rows -> 1 merged row)
    amat = jnp.asarray(
        (ro[None, :] // NB == np.arange(R)[:, None]).astype(np.float32), bf16)
    # blkmask[r_o, j*HD+d] = 1 iff j == r_o % NB (selects the lane block of merged row)
    lane = np.arange(C)
    bmask = jnp.asarray(
        ((lane[None, :] // HD) == (ro[:, None] % NB)).astype(np.float32), jnp.float32)

    return wpT, w1t, w2t, vecs, amask, amat, bmask


# ---------------- pure-JAX reference (mirrors the PyTorch code) ----------------
def ref_forward(kv, x, p):
    k = kv.reshape(B, N, 1, H, HD).transpose(2, 0, 3, 1, 4)   # (1,B,H,N,hd)
    v = k
    q = x.reshape(B, N, 1, H, HD).transpose(2, 0, 3, 1, 4)
    attn = jnp.einsum("zbhnd,zbhmd->zbhnm", q, k) * SCALE
    attn = jax.nn.softmax(attn, axis=-1)
    o = jnp.einsum("zbhnm,zbhmd->zbhnd", attn, v)             # (1,B,H,N,hd)
    o = jnp.transpose(o, (0, 2, 1, 3, 4)).reshape(B, N, C)    # quirky merge
    o = o @ p["proj_w"].T + p["proj_b"]
    x1 = x + o
    mu = x1.mean(-1, keepdims=True)
    var = ((x1 - mu) ** 2).mean(-1, keepdims=True)
    xn = (x1 - mu) / jnp.sqrt(var + LN_EPS) * p["ln2_w"] + p["ln2_b"]
    hcur = xn @ p["fc1_w"].T + p["fc1_b"]
    hcur = 0.5 * hcur * (1.0 + jax.lax.erf(hcur * INV_SQRT2))  # exact GELU
    m = hcur @ p["fc2_w"].T + p["fc2_b"]
    return x1 + m


# ---------------- deterministic parameter init ----------------
def make_params(key):
    ks = jax.random.split(key, 6)
    f32 = jnp.float32
    return {
        "proj_w": 0.05 * jax.random.normal(ks[0], (C, C), f32),
        "proj_b": 0.01 * jax.random.normal(ks[1], (C,), f32),
        "ln2_w": jnp.ones((C,), f32),
        "ln2_b": jnp.zeros((C,), f32),
        "fc1_w": 0.05 * jax.random.normal(ks[2], (HID, C), f32),
        "fc1_b": 0.01 * jax.random.normal(ks[3], (HID,), f32),
        "fc2_w": 0.05 * jax.random.normal(ks[4], (C, HID), f32),
        "fc2_b": 0.01 * jax.random.normal(ks[5], (C,), f32),
    }


if __name__ == "__main__":
    key = jax.random.PRNGKey(0)
    k_kv, k_x, k_p = jax.random.split(key, 3)
    kv = jax.random.normal(k_kv, (B, N, C), jnp.float32)
    x = jax.random.normal(k_x, (B, N, C), jnp.float32)
    params = make_params(k_p)
    prepped = prepare_params(params)     # one-time, outside jit

    out = decoder_trans(kv, x, *prepped)
    out = jax.block_until_ready(out)

    ref = ref_forward(kv, x, params)
    np.testing.assert_allclose(np.asarray(out), np.asarray(ref),
                               rtol=5e-2, atol=5e-2)
    print("KERNEL_OK")
</pallas_src>

<mosaic_0001>
module attributes {stable_mosaic.version = 11 : i64} {
  func.func @decoder_kernel(%arg0: i32, %arg1: memref<16x32xf32, #tpu.memory_space<vmem>>, %arg2: memref<16x32xf32, #tpu.memory_space<vmem>>, %arg3: memref<32x32xbf16, #tpu.memory_space<vmem>>, %arg4: memref<32x128xbf16, #tpu.memory_space<vmem>>, %arg5: memref<128x32xbf16, #tpu.memory_space<vmem>>, %arg6: memref<8x128xf32, #tpu.memory_space<vmem>>, %arg7: memref<64x64xf32, #tpu.memory_space<vmem>>, %arg8: memref<16x64xbf16, #tpu.memory_space<vmem>>, %arg9: memref<64x32xf32, #tpu.memory_space<vmem>>, %arg10: memref<16x32xf32, #tpu.memory_space<vmem>>) attributes {dimension_semantics = [#tpu.dimension_semantics<arbitrary>], iteration_bounds = array<i64: 1>, scalar_prefetch = 0 : i64, scratch_operands = 0 : i64, tpu.core_type = #tpu.core_type<tc>, window_params = [{pipeline_mode = #tpu.pipeline_mode<synchronous>, transform_indices = @transform_0, window_bounds = array<i64: 16, 32>}, {pipeline_mode = #tpu.pipeline_mode<synchronous>, transform_indices = @transform_1, window_bounds = array<i64: 16, 32>}, {pipeline_mode = #tpu.pipeline_mode<synchronous>, transform_indices = @transform_2, window_bounds = array<i64: 32, 32>}, {pipeline_mode = #tpu.pipeline_mode<synchronous>, transform_indices = @transform_3, window_bounds = array<i64: 32, 128>}, {pipeline_mode = #tpu.pipeline_mode<synchronous>, transform_indices = @transform_4, window_bounds = array<i64: 128, 32>}, {pipeline_mode = #tpu.pipeline_mode<synchronous>, transform_indices = @transform_5, window_bounds = array<i64: 8, 128>}, {pipeline_mode = #tpu.pipeline_mode<synchronous>, transform_indices = @transform_6, window_bounds = array<i64: 64, 64>}, {pipeline_mode = #tpu.pipeline_mode<synchronous>, transform_indices = @transform_7, window_bounds = array<i64: 16, 64>}, {pipeline_mode = #tpu.pipeline_mode<synchronous>, transform_indices = @transform_8, window_bounds = array<i64: 64, 32>}, {pipeline_mode = #tpu.pipeline_mode<synchronous>, transform_indices = @transform_9, window_bounds = array<i64: 16, 32>}]} {
    %c0 = arith.constant 0 : index
    %c0_0 = arith.constant 0 : index
    %0 = vector.load %arg2[%c0, %c0_0] : memref<16x32xf32, #tpu.memory_space<vmem>>, vector<16x32xf32>
    %c0_1 = arith.constant 0 : index
    %c0_2 = arith.constant 0 : index
    %1 = vector.load %arg1[%c0_1, %c0_2] : memref<16x32xf32, #tpu.memory_space<vmem>>, vector<16x32xf32>
    %c0_3 = arith.constant 0 : index
    %c0_4 = arith.constant 0 : index
    %2 = vector.load %arg6[%c0_3, %c0_4] : memref<8x128xf32, #tpu.memory_space<vmem>>, vector<8x128xf32>
    %3 = vector.extract_strided_slice %2 {offsets = [0, 0], sizes = [1, 32], strides = [1, 1]} : vector<8x128xf32> to vector<1x32xf32>
    %4 = vector.extract_strided_slice %2 {offsets = [1, 0], sizes = [1, 32], strides = [1, 1]} : vector<8x128xf32> to vector<1x32xf32>
    %5 = vector.extract_strided_slice %2 {offsets = [2, 0], sizes = [1, 32], strides = [1, 1]} : vector<8x128xf32> to vector<1x32xf32>
    %6 = vector.extract_strided_slice %2 {offsets = [3, 0], sizes = [1, 32], strides = [1, 1]} : vector<8x128xf32> to vector<1x32xf32>
    %7 = vector.extract_strided_slice %2 {offsets = [4, 0], sizes = [1, 128], strides = [1, 1]} : vector<8x128xf32> to vector<1x128xf32>
    %8 = vector.extract_strided_slice %0 {offsets = [0, 0], sizes = [16, 8], strides = [1, 1]} : vector<16x32xf32> to vector<16x8xf32>
    %9 = vector.extract_strided_slice %0 {offsets = [0, 8], sizes = [16, 8], strides = [1, 1]} : vector<16x32xf32> to vector<16x8xf32>
    %10 = vector.extract_strided_slice %0 {offsets = [0, 16], sizes = [16, 8], strides = [1, 1]} : vector<16x32xf32> to vector<16x8xf32>
    %11 = vector.extract_strided_slice %0 {offsets = [0, 24], sizes = [16, 8], strides = [1, 1]} : vector<16x32xf32> to vector<16x8xf32>
    %12 = tpu.concatenate %8, %9, %10, %11 in 0 : vector<16x8xf32>, vector<16x8xf32>, vector<16x8xf32>, vector<16x8xf32> -> vector<64x8xf32>
    %13 = arith.truncf %12 : vector<64x8xf32> to vector<64x8xbf16>
    %14 = vector.extract_strided_slice %1 {offsets = [0, 0], sizes = [16, 8], strides = [1, 1]} : vector<16x32xf32> to vector<16x8xf32>
    %15 = vector.extract_strided_slice %1 {offsets = [0, 8], sizes = [16, 8], strides = [1, 1]} : vector<16x32xf32> to vector<16x8xf32>
    %16 = vector.extract_strided_slice %1 {offsets = [0, 16], sizes = [16, 8], strides = [1, 1]} : vector<16x32xf32> to vector<16x8xf32>
    %17 = vector.extract_strided_slice %1 {offsets = [0, 24], sizes = [16, 8], strides = [1, 1]} : vector<16x32xf32> to vector<16x8xf32>
    %18 = tpu.concatenate %14, %15, %16, %17 in 0 : vector<16x8xf32>, vector<16x8xf32>, vector<16x8xf32>, vector<16x8xf32> -> vector<64x8xf32>
    %19 = arith.truncf %18 : vector<64x8xf32> to vector<64x8xbf16>
    %cst = arith.constant dense<0.000000e+00> : vector<64x64xf32>
    %20 = tpu.matmul %13, %19, %cst {dimension_numbers = #tpu.dot_dimension_numbers<[1], [1], [0], [0], [0, 0, 1, 0], [], []>} : vector<64x8xbf16>, vector<64x8xbf16>, vector<64x64xf32> -> vector<64x64xf32>
    %cst_5 = arith.constant 0.353553385 : f32
    %21 = vector.broadcast %cst_5 : f32 to vector<64x64xf32>
    %22 = arith.mulf %20, %21 : vector<64x64xf32>
    %c0_6 = arith.constant 0 : index
    %c0_7 = arith.constant 0 : index
    %23 = vector.load %arg7[%c0_6, %c0_7] : memref<64x64xf32, #tpu.memory_space<vmem>>, vector<64x64xf32>
    %24 = arith.addf %22, %23 : vector<64x64xf32>
    %cst_8 = arith.constant dense<0xFF800000> : vector<64xf32>
    %25 = vector.multi_reduction <maximumf>, %24, %cst_8 [1] : vector<64x64xf32> to vector<64xf32>
    %26 = vector.shape_cast %25 : vector<64xf32> to vector<64x1xf32>
    %27 = vector.broadcast %26 : vector<64x1xf32> to vector<64x64xf32>
    %28 = arith.subf %24, %27 : vector<64x64xf32>
    %29 = math.exp %28 : vector<64x64xf32>
    %cst_9 = arith.constant dense<0.000000e+00> : vector<64xf32>
    %30 = vector.multi_reduction <add>, %29, %cst_9 [1] : vector<64x64xf32> to vector<64xf32>
    %31 = vector.shape_cast %30 : vector<64xf32> to vector<64x1xf32>
    %32 = tpu.reciprocal %31 {approx = true} : vector<64x1xf32> -> vector<64x1xf32>
    %33 = vector.broadcast %32 : vector<64x1xf32> to vector<64x64xf32>
    %34 = arith.mulf %29, %33 : vector<64x64xf32>
    %35 = arith.truncf %34 : vector<64x64xf32> to vector<64x64xbf16>
    %cst_10 = arith.constant dense<0.000000e+00> : vector<64x8xf32>
    %36 = tpu.matmul %35, %19, %cst_10 {dimension_numbers = #tpu.dot_dimension_numbers<[1], [0], [0], [1], [0, 0, 1, 1], [], []>} : vector<64x64xbf16>, vector<64x8xbf16>, vector<64x8xf32> -> vector<64x8xf32>
    %37 = tpu.concatenate %36, %36, %36, %36 in 1 : vector<64x8xf32>, vector<64x8xf32>, vector<64x8xf32>, vector<64x8xf32> -> vector<64x32xf32>
    %c0_11 = arith.constant 0 : index
    %c0_12 = arith.constant 0 : index
    %38 = vector.load %arg9[%c0_11, %c0_12] : memref<64x32xf32, #tpu.memory_space<vmem>>, vector<64x32xf32>
    %39 = arith.mulf %37, %38 : vector<64x32xf32>
    %40 = arith.truncf %39 : vector<64x32xf32> to vector<64x32xbf16>
    %c0_13 = arith.constant 0 : index
    %c0_14 = arith.constant 0 : index
    %41 = vector.load %arg8[%c0_13, %c0_14] : memref<16x64xbf16, #tpu.memory_space<vmem>>, vector<16x64xbf16>
    %cst_15 = arith.constant dense<0.000000e+00> : vector<16x32xf32>
    %42 = tpu.matmul %41, %40, %cst_15 {dimension_numbers = #tpu.dot_dimension_numbers<[1], [0], [0], [1], [0, 0, 1, 1], [], []>} : vector<16x64xbf16>, vector<64x32xbf16>, vector<16x32xf32> -> vector<16x32xf32>
    %43 = arith.truncf %42 : vector<16x32xf32> to vector<16x32xbf16>
    %c0_16 = arith.constant 0 : index
    %c0_17 = arith.constant 0 : index
    %44 = vector.load %arg3[%c0_16, %c0_17] : memref<32x32xbf16, #tpu.memory_space<vmem>>, vector<32x32xbf16>
    %cst_18 = arith.constant dense<0.000000e+00> : vector<16x32xf32>
    %45 = tpu.matmul %43, %44, %cst_18 {dimension_numbers = #tpu.dot_dimension_numbers<[1], [0], [0], [1], [0, 0, 1, 1], [], []>} : vector<16x32xbf16>, vector<32x32xbf16>, vector<16x32xf32> -> vector<16x32xf32>
    %46 = vector.broadcast %3 : vector<1x32xf32> to vector<16x32xf32>
    %47 = arith.addf %45, %46 : vector<16x32xf32>
    %48 = arith.addf %0, %47 : vector<16x32xf32>
    %cst_19 = arith.constant dense<0.000000e+00> : vector<16xf32>
    %49 = vector.multi_reduction <add>, %48, %cst_19 [1] : vector<16x32xf32> to vector<16xf32>
    %50 = vector.shape_cast %49 : vector<16xf32> to vector<16x1xf32>
    %cst_20 = arith.constant 3.200000e+01 : f32
    %51 = vector.broadcast %cst_20 : f32 to vector<16x1xf32>
    %52 = arith.divf %50, %51 : vector<16x1xf32>
    %53 = vector.broadcast %52 : vector<16x1xf32> to vector<16x32xf32>
    %54 = arith.subf %48, %53 : vector<16x32xf32>
    %55 = arith.mulf %54, %54 : vector<16x32xf32>
    %cst_21 = arith.constant dense<0.000000e+00> : vector<16xf32>
    %56 = vector.multi_reduction <add>, %55, %cst_21 [1] : vector<16x32xf32> to vector<16xf32>
    %57 = vector.shape_cast %56 : vector<16xf32> to vector<16x1xf32>
    %cst_22 = arith.constant 3.200000e+01 : f32
    %58 = vector.broadcast %cst_22 : f32 to vector<16x1xf32>
    %59 = arith.divf %57, %58 : vector<16x1xf32>
    %60 = vector.broadcast %52 : vector<16x1xf32> to vector<16x32xf32>
    %61 = arith.subf %48, %60 : vector<16x32xf32>
    %cst_23 = arith.constant 9.99999974E-6 : f32
    %62 = vector.broadcast %cst_23 : f32 to vector<16x1xf32>
    %63 = arith.addf %59, %62 : vector<16x1xf32>
    %64 = math.rsqrt %63 : vector<16x1xf32>
    %65 = vector.broadcast %64 : vector<16x1xf32> to vector<16x32xf32>
    %66 = arith.mulf %61, %65 : vector<16x32xf32>
    %67 = vector.broadcast %4 : vector<1x32xf32> to vector<16x32xf32>
    %68 = arith.mulf %66, %67 : vector<16x32xf32>
    %69 = vector.broadcast %5 : vector<1x32xf32> to vector<16x32xf32>
    %70 = arith.addf %68, %69 : vector<16x32xf32>
    %71 = arith.truncf %70 : vector<16x32xf32> to vector<16x32xbf16>
    %c0_24 = arith.constant 0 : index
    %c0_25 = arith.constant 0 : index
    %72 = vector.load %arg4[%c0_24, %c0_25] : memref<32x128xbf16, #tpu.memory_space<vmem>>, vector<32x128xbf16>
    %cst_26 = arith.constant dense<0.000000e+00> : vector<16x128xf32>
    %73 = tpu.matmul %71, %72, %cst_26 {dimension_numbers = #tpu.dot_dimension_numbers<[1], [0], [0], [1], [0, 0, 1, 1], [], []>} : vector<16x32xbf16>, vector<32x128xbf16>, vector<16x128xf32> -> vector<16x128xf32>
    %74 = vector.broadcast %7 : vector<1x128xf32> to vector<16x128xf32>
    %75 = arith.addf %73, %74 : vector<16x128xf32>
    %cst_27 = arith.constant 5.000000e-01 : f32
    %76 = vector.broadcast %cst_27 : f32 to vector<16x128xf32>
    %77 = arith.mulf %76, %75 : vector<16x128xf32>
    %cst_28 = arith.constant 4.471500e-02 : f32
    %78 = vector.broadcast %cst_28 : f32 to vector<16x128xf32>
    %79 = arith.mulf %78, %75 : vector<16x128xf32>
    %80 = arith.mulf %79, %75 : vector<16x128xf32>
    %81 = arith.mulf %80, %75 : vector<16x128xf32>
    %82 = arith.addf %75, %81 : vector<16x128xf32>
    %cst_29 = arith.constant 0.797884583 : f32
    %83 = vector.broadcast %cst_29 : f32 to vector<16x128xf32>
    %84 = arith.mulf %83, %82 : vector<16x128xf32>
    %85 = math.tanh %84 : vector<16x128xf32>
    %cst_30 = arith.constant 1.000000e+00 : f32
    %86 = vector.broadcast %cst_30 : f32 to vector<16x128xf32>
    %87 = arith.addf %86, %85 : vector<16x128xf32>
    %88 = arith.mulf %77, %87 : vector<16x128xf32>
    %89 = arith.truncf %88 : vector<16x128xf32> to vector<16x128xbf16>
    %c0_31 = arith.constant 0 : index
    %c0_32 = arith.constant 0 : index
    %90 = vector.load %arg5[%c0_31, %c0_32] : memref<128x32xbf16, #tpu.memory_space<vmem>>, vector<128x32xbf16>
    %cst_33 = arith.constant dense<0.000000e+00> : vector<16x32xf32>
    %91 = tpu.matmul %89, %90, %cst_33 {dimension_numbers = #tpu.dot_dimension_numbers<[1], [0], [0], [1], [0, 0, 1, 1], [], []>} : vector<16x128xbf16>, vector<128x32xbf16>, vector<16x32xf32> -> vector<16x32xf32>
    %92 = vector.broadcast %6 : vector<1x32xf32> to vector<16x32xf32>
    %93 = arith.addf %91, %92 : vector<16x32xf32>
    %94 = arith.addf %48, %93 : vector<16x32xf32>
    %c0_34 = arith.constant 0 : index
    %c0_35 = arith.constant 0 : index
    %95 = vector.load %arg10[%c0_34, %c0_35] : memref<16x32xf32, #tpu.memory_space<vmem>>, vector<16x32xf32>
    tpu.vector_store %arg10[%c0_34, %c0_35], %94 {strides = array<i32>} : memref<16x32xf32, #tpu.memory_space<vmem>>, vector<16x32xf32>,
    return
  }
  func.func @transform_0(%arg0: i32) -> (i32, i32) {
    %c0_i32 = arith.constant 0 : i32
    %c0_i32_0 = arith.constant 0 : i32
    %c0_i32_1 = arith.constant 0 : i32
    return %c0_i32, %c0_i32_0 : i32, i32
  }
  func.func @transform_1(%arg0: i32) -> (i32, i32) {
    %c0_i32 = arith.constant 0 : i32
    %c0_i32_0 = arith.constant 0 : i32
    %c0_i32_1 = arith.constant 0 : i32
    return %c0_i32, %c0_i32_0 : i32, i32
  }
  func.func @transform_2(%arg0: i32) -> (i32, i32) {
    %c0_i32 = arith.constant 0 : i32
    %c0_i32_0 = arith.constant 0 : i32
    %c0_i32_1 = arith.constant 0 : i32
    return %c0_i32, %c0_i32_0 : i32, i32
  }
  func.func @transform_3(%arg0: i32) -> (i32, i32) {
    %c0_i32 = arith.constant 0 : i32
    %c0_i32_0 = arith.constant 0 : i32
    %c0_i32_1 = arith.constant 0 : i32
    return %c0_i32, %c0_i32_0 : i32, i32
  }
  func.func @transform_4(%arg0: i32) -> (i32, i32) {
    %c0_i32 = arith.constant 0 : i32
    %c0_i32_0 = arith.constant 0 : i32
    %c0_i32_1 = arith.constant 0 : i32
    return %c0_i32, %c0_i32_0 : i32, i32
  }
  func.func @transform_5(%arg0: i32) -> (i32, i32) {
    %c0_i32 = arith.constant 0 : i32
    %c0_i32_0 = arith.constant 0 : i32
    %c0_i32_1 = arith.constant 0 : i32
    return %c0_i32, %c0_i32_0 : i32, i32
  }
  func.func @transform_6(%arg0: i32) -> (i32, i32) {
    %c0_i32 = arith.constant 0 : i32
    %c0_i32_0 = arith.constant 0 : i32
    %c0_i32_1 = arith.constant 0 : i32
    return %c0_i32, %c0_i32_0 : i32, i32
  }
  func.func @transform_7(%arg0: i32) -> (i32, i32) {
    %c0_i32 = arith.constant 0 : i32
    %c0_i32_0 = arith.constant 0 : i32
    %c0_i32_1 = arith.constant 0 : i32
    return %c0_i32, %c0_i32_0 : i32, i32
  }
  func.func @transform_8(%arg0: i32) -> (i32, i32) {
    %c0_i32 = arith.constant 0 : i32
    %c0_i32_0 = arith.constant 0 : i32
    %c0_i32_1 = arith.constant 0 : i32
    return %c0_i32, %c0_i32_0 : i32, i32
  }
  func.func @transform_9(%arg0: i32) -> (i32, i32) {
    %c0_i32 = arith.constant 0 : i32
    %c0_i32_0 = arith.constant 0 : i32
    %c0_i32_1 = arith.constant 0 : i32
    return %c0_i32, %c0_i32_0 : i32, i32
  }
}

</mosaic_0001>

<bundles_post_ra>
// kernel: decoder_trans.1
= control target key start
LH: loop header
LB: loop body
LE: loop exit
PB: predicated region body
PF: predicated region fallthrough
CT: control target
= control target key end

     0   :  { %s1127_s17 = smov 104   ;;  %s1128_s18 = smov 120   ;;  %s1462_s0 = inlined_call_operand.vmem [shape: f32[16,32], index: 0, kind: input, shape index: {}]   ;;  %s1463_s1 = inlined_call_operand.vmem [shape: f32[16,32], index: 1, kind: input, shape index: {}]   ;;  %s1464_s2 = inlined_call_operand.vmem [shape: bf16[32,32], index: 2, kind: input, shape index: {}]   ;;  %s1465_s3 = inlined_call_operand.vmem [shape: bf16[32,128], index: 3, kind: input, shape index: {}]   ;;  %s1466_s4 = inlined_call_operand.vmem [shape: bf16[128,32], index: 4, kind: input, shape index: {}]   ;;  %s1467_s5 = inlined_call_operand.vmem [shape: f32[8,128], index: 5, kind: input, shape index: {}]   ;;  %s1468_s6 = inlined_call_operand.vmem [shape: f32[64,64], index: 6, kind: input, shape index: {}]   ;;  %s1469_s7 = inlined_call_operand.vmem [shape: bf16[16,64], index: 7, kind: input, shape index: {}]   ;;  %s1470_s8 = inlined_call_operand.vmem [shape: f32[64,32], index: 8, kind: input, shape index: {}]   ;;  %s1471_s9 = inlined_call_operand.hbm [shape: f32[16,32], index: 9, kind: output, shape index: {}]  }
   0x1   :  { %v36_v0 = vld [vmem:[%s1462_s0] sm:$0xff]  ;;  %v37_v1 = vld [vmem:[%s1462_s0 + $0x8] sm:$0xff]  ;;  %s1129_s19 = smov 112  }
   0x2   :  { %v1196_v2 = vld [vmem:[%s1463_s1] sm:$0xff]  ;;  %v1022_v3 = vpack.i.bf16 %v37_v1, %v36_v0  ;;  %v1201_v4 = vld [vmem:[%s1463_s1 + $0x8] sm:$0xff] }
   0x3   :  { %v1037_v5 = vpack.i.bf16 %v1201_v4, %v1196_v2 }
   0x4   :  { %1023 = vrot.lane.b32.xlu0 %v1022_v3, %s1127_s17  ;;  %1033 = vrot.lane.b32.xlu1 %v1022_v3, %s1128_s18 }
   0x8   :  { %1028 = vrot.lane.b32.xlu0 %v1022_v3, %s1129_s19  ;;  %1038 = vrot.lane.b32.xlu1 %v1037_v5, %s1128_s18 }
   0x9   :  { %14 = vsyncpa [#allocation3], 0  ;;  %v83_v6 = vpack.c.bf16 %v37_v1, %v36_v0  ;;  %v59_v7 = vpack.c.bf16 %v1201_v4, %v1196_v2  ;;  %vm87_vm0 = vcmask 64512   ;;  %v185_v38 = vld [vmem:[%s1468_s6] sm:$0xff]  ;;  %v187_v42 = vld [vmem:[%s1468_s6 + $0x10] sm:$0xff]  ;;  %vm201_vm1 = vcmask 523264  }
   0xa   :  { %v186_v46 = vld [vmem:[%s1468_s6 + $0x8] sm:$0xff]  ;;  %v188_v50 = vld [vmem:[%s1468_s6 + $0x18] sm:$0xff]  ;;  %v189_v55 = vld [vmem:[%s1468_s6 + $0x20] sm:$0xff]  ;;  %s1131_s13 = smov 16   ;;  %s1132_s14 = smov 24   ;;  %vm1134_vm2 = vmmov 0  }
   0xb   :  { %936 = vmatprep.mubr.msk.bf16.mxu0 %vm87_vm0, %v59_v7  ;;  %v101_v24 = vsel %vm87_vm0, %v83_v6, 0  ;;  %v191_v61 = vld [vmem:[%s1468_s6 + $0x30] sm:$0xff]  ;;  %v190_v1 = vld [vmem:[%s1468_s6 + $0x28] sm:$0xff]  ;;  %vm459_vm3 = vcmask 130048   ;;  %vm468_vm4 = vcmask 195584   ;;  %vm569_vm5 = vcmask 261120  }
   0xc   :  { %1043 = vrot.lane.b32.xlu0 %v1037_v5, %s1129_s19  ;;  %1048 = vrot.lane.b32.xlu1 %v1037_v5, %s1127_s17 }
  0x76   :  { %v1024_v8 = vpop.permute.xlu0 %1023  ;;  %v1034_v13 = vpop.permute.xlu1 %1033 }
  0x77   :  { %v1026_v9 = vunpack.i.h.bf16 %v1024_v8  ;;  %v1025_v10 = vunpack.i.l.bf16 %v1024_v8  ;;  %v1036_v18 = vunpack.i.h.bf16 %v1034_v13  ;;  %v1035_v19 = vunpack.i.l.bf16 %v1034_v13  ;;  %v192_v8 = vld [vmem:[%s1468_s6 + $0x38] sm:$0xff]  ;;  %s1130_s6 = smov 8  }
  0x79   :  { %v86_v11 = vpack.c.bf16 %v1026_v9, %v1025_v10  ;;  %v84_v21 = vpack.c.bf16 %v1036_v18, %v1035_v19 }
  0x7a   :  { %v1029_v12 = vpop.permute.xlu0 %1028  ;;  %v1039_v23 = vpop.permute.xlu1 %1038 }
  0x7b   :  { %1008 = vmatprep.subr.msk.bf16.mxu0 %vm87_vm0, %v86_v11  ;;  %v110_v14 = vsel %vm87_vm0, %v86_v11, 0  ;;  %v1031_v15 = vunpack.i.h.bf16 %v1029_v12  ;;  %v1030_v16 = vunpack.i.l.bf16 %v1029_v12  ;;  %v104_v22 = vsel %vm87_vm0, %v84_v21, 0 }
  0x7c   :  { %929 = vmatpush3.bf16.xpose.msra.mxu0 %v110_v14  ;;  %v1041_v26 = vunpack.i.h.bf16 %v1039_v23  ;;  %v1040_v27 = vunpack.i.l.bf16 %v1039_v23 }
  0x7d   :  { %v85_v17 = vpack.c.bf16 %v1031_v15, %v1030_v16 }
  0x7e   :  { %v1044_v25 = vpop.permute.xlu0 %1043  ;;  %v60_v30 = vpack.c.bf16 %v1041_v26, %v1040_v27  ;;  %v1049_v32 = vpop.permute.xlu1 %1048 }
  0x7f   :  { %1009 = vmatprep.subr.msk.bf16.mxu0 %vm87_vm0, %v85_v17  ;;  %v107_v20 = vsel %vm87_vm0, %v85_v17, 0  ;;  %v1046_v28 = vunpack.i.h.bf16 %v1044_v25  ;;  %v1045_v29 = vunpack.i.l.bf16 %v1044_v25  ;;  %v1051_v33 = vunpack.i.h.bf16 %v1049_v32 }
  0x80   :  { %v1050_v34 = vunpack.i.l.bf16 %v1049_v32 }
  0x81   :  { %v61_v31 = vpack.c.bf16 %v1046_v28, %v1045_v29 }
  0x82   :  { %v62_v35 = vpack.c.bf16 %v1051_v33, %v1050_v34 }
  0x84   :  { %931 = vmatpush3.bf16.xpose.msra.mxu0 %v107_v20 }
  0x85   :  { %1010 = vmatprep.subr.msk.bf16.mxu0 %vm87_vm0, %v84_v21 }
  0x8c   :  { %933 = vmatpush3.bf16.xpose.msra.mxu0 %v104_v22 }
  0x8d   :  { %1011 = vmatprep.subr.msk.bf16.mxu0 %vm87_vm0, %v83_v6 }
  0x94   :  { %935 = vmatpush3.bf16.xpose.msra.mxu0 %v101_v24 }
  0x95   :  { %944 = vmatprep.subr.bf16.mxu0 %v86_v11 }
  0x9b   :  { %937 = vmatmul.mubr.msk.bf16.vlgmr.msra.gmra.mxu0 %vm87_vm0, %v60_v30 }
  0x9c   :  { %945 = vmatpush3.bf16.msra.mxu0 %v86_v11  ;;  %940 = vmatprep.mubr.msk.bf16.mxu0 %vm87_vm0, %v61_v31 }
  0x9d   :  { %946 = vmatprep.subr.bf16.mxu0 %v85_v17 }
  0xa0   :  { %947 = vmatpush3.bf16.msra.mxu0 %v85_v17 }
  0xa1   :  { %948 = vmatprep.subr.bf16.mxu0 %v84_v21 }
  0xa3   :  { %941 = vmatmul.mubr.msk.bf16.gmra.mxu0 %vm87_vm0, %v62_v35 }
  0xa4   :  { %949 = vmatpush3.bf16.msra.mxu0 %v84_v21 }
  0xa5   :  { %950 = vmatprep.subr.bf16.mxu0 %v83_v6 }
  0xa8   :  { %951 = vmatpush3.bf16.msra.mxu0 %v83_v6 }
 0x15b   :  { %v938_v36 = vpop.f32.mrf.mxu0 }
 0x15c   :  { %v179_v39 = vmul.f32 0.35355338, %v938_v36 }
 0x15d   :  { %v146_v37 = vpop.f32.mrf.mxu0 }
 0x15e   :  { %v177_v40 = vmul.f32 0.35355338, %v146_v37  ;;  %v195_v49 = vadd.f32 %v187_v42, %v179_v39 }
 0x15f   :  { %v939_v41 = vpop.f32.mrf.mxu0 }
 0x160   :  { %v193_v43 = vadd.f32 %v185_v38, %v177_v40  ;;  %v180_v44 = vmul.f32 0.35355338, %v939_v41  ;;  %v208_v58 = vsel %vm201_vm1, %v195_v49, -inf }
 0x161   :  { %v149_v45 = vpop.f32.mrf.mxu0 }
 0x162   :  { %v178_v47 = vmul.f32 0.35355338, %v149_v45  ;;  %v202_v48 = vsel %vm201_vm1, %v193_v43, -inf  ;;  %v196_v54 = vadd.f32 %v188_v50, %v180_v44 }
 0x163   :  { %203 = vmax.xlane.f32.xlu0 %v202_v48  ;;  %v942_v51 = vpop.f32.mrf.mxu0 }
 0x164   :  { %v194_v52 = vadd.f32 %v186_v46, %v178_v47  ;;  %v183_v56 = vmul.f32 0.35355338, %v942_v51  ;;  %v211_v0 = vsel %vm201_vm1, %v196_v54, -inf }
 0x165   :  { %v162_v53 = vpop.f32.mrf.mxu0 }
 0x166   :  { %v181_v57 = vmul.f32 0.35355338, %v162_v53  ;;  %v205_v59 = vsel %vm201_vm1, %v194_v52, -inf  ;;  %v199_v7 = vadd.f32 %v191_v61, %v183_v56 }
 0x167   :  { %209 = vmax.xlane.f32.xlu0 %v208_v58  ;;  %206 = vmax.xlane.f32.xlu1 %v205_v59  ;;  %v943_v60 = vpop.f32.mrf.mxu0 }
 0x168   :  { %v197_v62 = vadd.f32 %v189_v55, %v181_v57  ;;  %v184_v3 = vmul.f32 0.35355338, %v943_v60  ;;  %v220_v10 = vsel %vm201_vm1, %v199_v7, -inf }
 0x169   :  { %v165_v63 = vpop.f32.mrf.mxu0 }
 0x16a   :  { %v182_v5 = vmul.f32 0.35355338, %v165_v63  ;;  %v214_v6 = vsel %vm201_vm1, %v197_v62, -inf  ;;  %v200_v12 = vadd.f32 %v192_v8, %v184_v3 }
 0x16b   :  { %212 = vmax.xlane.f32.xlu0 %v211_v0  ;;  %215 = vmax.xlane.f32.xlu1 %v214_v6 }
 0x16c   :  { %v198_v9 = vadd.f32 %v190_v1, %v182_v5  ;;  %v223_v13 = vsel %vm201_vm1, %v200_v12, -inf }
 0x16e   :  { %v217_v11 = vsel %vm201_vm1, %v198_v9, -inf }
 0x16f   :  { %221 = vmax.xlane.f32.xlu1 %v220_v10  ;;  %218 = vmax.xlane.f32.xlu0 %v217_v11 }
 0x173   :  { %224 = vmax.xlane.f32.xlu0 %v223_v13 }
 0x1ec   :  { %v204_v14 = vpop.xlane.xlu0 %203 }
 0x1ed   :  { %v226_v15 = vsub.f32 %v193_v43, %v204_v14 }
 0x1ef   :  { %v234_v16 = vmul.f32 1.442695, %v226_v15 }
 0x1f0   :  { %v210_v17 = vpop.xlane.xlu0 %209  ;;  %v207_v18 = vpop.xlane.xlu1 %206 }
 0x1f1   :  { %1065 = vpow2.f32 %v234_v16  ;;  %v228_v19 = vsub.f32 %v195_v49, %v210_v17  ;;  %v227_v20 = vsub.f32 %v194_v52, %v207_v18 }
 0x1f3   :  { %v238_v21 = vmul.f32 1.442695, %v228_v19  ;;  %v236_v22 = vmul.f32 1.442695, %v227_v20 }
 0x1f4   :  { %v213_v23 = vpop.xlane.xlu0 %212  ;;  %v216_v24 = vpop.xlane.xlu1 %215 }
 0x1f5   :  { %1067 = vpow2.f32 %v238_v21  ;;  %v229_v25 = vsub.f32 %v196_v54, %v213_v23  ;;  %v230_v26 = vsub.f32 %v197_v62, %v216_v24 }
 0x1f6   :  { %1069 = vpow2.f32 %v236_v22 }
 0x1f7   :  { %v240_v27 = vmul.f32 1.442695, %v229_v25  ;;  %v242_v28 = vmul.f32 1.442695, %v230_v26 }
 0x1f8   :  { %v222_v29 = vpop.xlane.xlu1 %221  ;;  %v219_v30 = vpop.xlane.xlu0 %218 }
 0x1f9   :  { %1071 = vpow2.f32 %v240_v27  ;;  %v232_v31 = vsub.f32 %v199_v7, %v222_v29  ;;  %v231_v32 = vsub.f32 %v198_v9, %v219_v30  ;;  %v1133_v27 = vmov 0.0  }
 0x1fa   :  { %1073 = vpow2.f32 %v242_v28  ;;  %960 = vmatprep.subr.bf16.mxu1 %v1133_v27  ;;  %980 = vmatprep.subr.bf16.mxu0 %v1133_v27 }
 0x1fb   :  { %v246_v33 = vmul.f32 1.442695, %v232_v31  ;;  %v244_v34 = vmul.f32 1.442695, %v231_v32  ;;  %968 = vmatprep.mubr.msk.bf16.mxu1 %vm1134_vm2, %v1133_v27 }
 0x1fc   :  { %v225_v35 = vpop.xlane.xlu0 %224 }
 0x1fd   :  { %1075 = vpow2.f32 %v246_v33  ;;  %v233_v36 = vsub.f32 %v200_v12, %v225_v35 }
 0x1fe   :  { %v1066_v37 = vpop.eup %1065  ;;  %1077 = vpow2.f32 %v244_v34 }
 0x1ff   :  { %v248_v38 = vmul.f32 1.442695, %v233_v36  ;;  %v250_v39 = vsel %vm201_vm1, %v1066_v37, 0.0 }
 0x200   :  { %251 = vadd.xlane.f32.xlu1 %v250_v39 }
 0x201   :  { %1079 = vpow2.f32 %v248_v38 }
 0x202   :  { %v1068_v40 = vpop.eup %1067 }
 0x203   :  { %v1070_v41 = vpop.eup %1069  ;;  %v256_v42 = vsel %vm201_vm1, %v1068_v40, 0.0 }
 0x204   :  { %257 = vadd.xlane.f32.xlu1 %v256_v42  ;;  %v253_v43 = vsel %vm201_vm1, %v1070_v41, 0.0 }
 0x205   :  { %254 = vadd.xlane.f32.xlu0 %v253_v43 }
 0x206   :  { %v1072_v44 = vpop.eup %1071 }
 0x207   :  { %v1074_v45 = vpop.eup %1073  ;;  %v259_v46 = vsel %vm201_vm1, %v1072_v44, 0.0 }
 0x208   :  { %v262_v47 = vsel %vm201_vm1, %v1074_v45, 0.0 }
 0x209   :  { %263 = vadd.xlane.f32.xlu1 %v262_v47  ;;  %260 = vadd.xlane.f32.xlu0 %v259_v46 }
 0x20a   :  { %v1076_v48 = vpop.eup %1075 }
 0x20b   :  { %v1078_v49 = vpop.eup %1077  ;;  %v268_v50 = vsel %vm201_vm1, %v1076_v48, 0.0 }
 0x20c   :  { %v265_v51 = vsel %vm201_vm1, %v1078_v49, 0.0 }
 0x20d   :  { %269 = vadd.xlane.f32.xlu1 %v268_v50  ;;  %266 = vadd.xlane.f32.xlu0 %v265_v51 }
 0x20e   :  { %v1080_v52 = vpop.eup %1079 }
 0x20f   :  { %v271_v53 = vsel %vm201_vm1, %v1080_v52, 0.0 }
 0x211   :  { %272 = vadd.xlane.f32.xlu0 %v271_v53 }
 0x289   :  { %v252_v54 = vpop.xlane.xlu1 %251 }
 0x28a   :  { %1081 = vrcp.f32 %v252_v54 }
 0x28d   :  { %v258_v55 = vpop.xlane.xlu1 %257 }
 0x28e   :  { %v255_v56 = vpop.xlane.xlu0 %254 }
 0x28f   :  { %1083 = vrcp.f32 %v255_v56 }
 0x290   :  { %1085 = vrcp.f32 %v258_v55 }
 0x292   :  { %v264_v57 = vpop.xlane.xlu1 %263  ;;  %v261_v58 = vpop.xlane.xlu0 %260 }
 0x293   :  { %1087 = vrcp.f32 %v261_v58 }
 0x294   :  { %1089 = vrcp.f32 %v264_v57 }
 0x296   :  { %v270_v59 = vpop.xlane.xlu1 %269  ;;  %v267_v60 = vpop.xlane.xlu0 %266 }
 0x297   :  { %1091 = vrcp.f32 %v267_v60  ;;  %v1082_v61 = vpop.eup %1081 }
 0x298   :  { %1093 = vrcp.f32 %v270_v59  ;;  %v282_v0 = vmul.f32 %v1082_v61, %v1066_v37 }
 0x29a   :  { %v273_v62 = vpop.xlane.xlu0 %272 }
 0x29b   :  { %1095 = vrcp.f32 %v273_v62 }
 0x29c   :  { %v1084_v63 = vpop.eup %1083 }
 0x29d   :  { %v283_v1 = vmul.f32 %v1084_v63, %v1070_v41  ;;  %v1086_v3 = vpop.eup %1085  ;;  %v481_v63 = vld [vmem:[%s1470_s8 + $0x20] sm:$0xff] }
 0x29e   :  { %v284_v7 = vmul.f32 %v1086_v3, %v1068_v40  ;;  %v482_v3 = vld [vmem:[%s1470_s8 + $0x28] sm:$0xff] }
 0x29f   :  { %v290_v5 = vpack.c.bf16 %v283_v1, %v282_v0 }
 0x2a0   :  { %v1088_v6 = vpop.eup %1087 }
 0x2a1   :  { %952 = vmatprep.mubr.msk.bf16.mxu0 %vm201_vm1, %v290_v5  ;;  %v285_v8 = vmul.f32 %v1088_v6, %v1072_v44  ;;  %v1090_v9 = vpop.eup %1089 }
 0x2a2   :  { %v286_v13 = vmul.f32 %v1090_v9, %v1074_v45  ;;  %v479_v9 = vld [vmem:[%s1470_s8 + $0x10] sm:$0xff] }
 0x2a3   :  { %v291_v10 = vpack.c.bf16 %v285_v8, %v284_v7 }
 0x2a4   :  { %v1092_v11 = vpop.eup %1091 }
 0x2a5   :  { %v1094_v12 = vpop.eup %1093  ;;  %953 = vmatmul.mubr.msk.bf16.vlgmr.msra.gmra.mxu0 %vm201_vm1, %v291_v10  ;;  %v287_v14 = vmul.f32 %v1092_v11, %v1078_v49  ;;  %v483_v49 = vld [vmem:[%s1470_s8 + $0x30] sm:$0xff] }
 0x2a6   :  { %v288_v17 = vmul.f32 %v1094_v12, %v1076_v48  ;;  %v484_v48 = vld [vmem:[%s1470_s8 + $0x38] sm:$0xff] }
 0x2a7   :  { %v292_v16 = vpack.c.bf16 %v287_v14, %v286_v13 }
 0x2a8   :  { %v1096_v15 = vpop.eup %1095 }
 0x2a9   :  { %v289_v18 = vmul.f32 %v1096_v15, %v1080_v52  ;;  %956 = vmatprep.mubr.msk.bf16.mxu0 %vm201_vm1, %v292_v16  ;;  %v480_v15 = vld [vmem:[%s1470_s8 + $0x18] sm:$0xff] }
 0x2ab   :  { %v293_v19 = vpack.c.bf16 %v289_v18, %v288_v17 }
 0x2ad   :  { %957 = vmatmul.mubr.msk.bf16.gmra.mxu0 %vm201_vm1, %v293_v19 }
 0x2ae   :  { %984 = vmatprep.mubr.msk.bf16.mxu0 %vm1134_vm2, %v1133_v27 }
 0x365   :  { %v1263_v20 = vpop.f32.mrf.mxu0 }
 0x366   :  { %383 = vrot.lane.b32.xlu0 %v1263_v20, %s1130_s6 }
 0x367   :  { %v1267_v21 = vpop.f32.mrf.mxu0 }
 0x369   :  { %v1269_v22 = vpop.f32.mrf.mxu0 }
 0x36a   :  { %407 = vrot.lane.b32.xlu0 %v1263_v20, %s1131_s13  ;;  %385 = vrot.lane.b32.xlu1 %v1269_v22, %s1130_s6 }
 0x36b   :  { %v1275_v23 = vpop.f32.mrf.mxu0 }
 0x36d   :  { %v958_v24 = vpop.f32.mrf.mxu0 }
 0x36e   :  { %409 = vrot.lane.b32.xlu1 %v1269_v22, %s1131_s13  ;;  %439 = vrot.lane.b32.xlu0 %v958_v24, %s1132_s14 }
 0x36f   :  { %v1279_v25 = vpop.f32.mrf.mxu0 }
 0x371   :  { %v959_v26 = vpop.f32.mrf.mxu0 }
 0x372   :  { %391 = vrot.lane.b32.xlu1 %v958_v24, %s1130_s6  ;;  %387 = vrot.lane.b32.xlu0 %v1279_v25, %s1130_s6 }
 0x373   :  { %v359_v28 = vpop.f32.mrf.mxu0 }
 0x376   :  { %415 = vrot.lane.b32.xlu1 %v958_v24, %s1131_s13  ;;  %411 = vrot.lane.b32.xlu0 %v1279_v25, %s1131_s13 }
 0x37a   :  { %433 = vrot.lane.b32.xlu1 %v1269_v22, %s1132_s14  ;;  %435 = vrot.lane.b32.xlu0 %v1279_v25, %s1132_s14 }
 0x37e   :  { %381 = vrot.lane.b32.xlu1 %v1275_v23, %s1130_s6  ;;  %393 = vrot.lane.b32.xlu0 %v959_v26, %s1130_s6 }
 0x382   :  { %417 = vrot.lane.b32.xlu1 %v959_v26, %s1131_s13  ;;  %431 = vrot.lane.b32.xlu0 %v1263_v20, %s1132_s14 }
 0x386   :  { %441 = vrot.lane.b32.xlu1 %v959_v26, %s1132_s14  ;;  %379 = vrot.lane.b32.xlu0 %v1267_v21, %s1130_s6 }
 0x38a   :  { %403 = vrot.lane.b32.xlu0 %v1267_v21, %s1131_s13  ;;  %389 = vrot.lane.b32.xlu1 %v359_v28, %s1130_s6 }
 0x38e   :  { %427 = vrot.lane.b32.xlu0 %v1267_v21, %s1132_s14  ;;  %413 = vrot.lane.b32.xlu1 %v359_v28, %s1131_s13 }
 0x392   :  { %437 = vrot.lane.b32.xlu1 %v359_v28, %s1132_s14 }
 0x396   :  { %405 = vrot.lane.b32.xlu1 %v1275_v23, %s1131_s13 }
 0x39a   :  { %429 = vrot.lane.b32.xlu1 %v1275_v23, %s1132_s14 }
 0x3d8   :  { %v384_v29 = vpop.permute.xlu0 %383 }
 0x3d9   :  { %v453_v62 = vsel %vm87_vm0, %v1263_v20, %v384_v29 }
 0x3dc   :  { %v386_v30 = vpop.permute.xlu1 %385  ;;  %v408_v31 = vpop.permute.xlu0 %407 }
 0x3dd   :  { %v462_v5 = vsel %vm459_vm3, %v453_v62, %v408_v31  ;;  %v454_v8 = vsel %vm87_vm0, %v1269_v22, %v386_v30  ;;  %v478_v30 = vld [vmem:[%s1470_s8 + $0x8] sm:$0xff] }
 0x3e0   :  { %v410_v32 = vpop.permute.xlu1 %409  ;;  %v440_v33 = vpop.permute.xlu0 %439 }
 0x3e1   :  { %v463_v12 = vsel %vm459_vm3, %v454_v8, %v410_v32 }
 0x3e4   :  { %v392_v34 = vpop.permute.xlu1 %391  ;;  %v388_v35 = vpop.permute.xlu0 %387 }
 0x3e5   :  { %v457_v42 = vsel %vm87_vm0, %v958_v24, %v392_v34  ;;  %v455_v59 = vsel %vm87_vm0, %v1279_v25, %v388_v35 }
 0x3e8   :  { %v416_v36 = vpop.permute.xlu1 %415  ;;  %v412_v37 = vpop.permute.xlu0 %411 }
 0x3e9   :  { %v466_v43 = vsel %vm459_vm3, %v457_v42, %v416_v36  ;;  %v464_v60 = vsel %vm459_vm3, %v455_v59, %v412_v37  ;;  %v1052_v36 = vld [vmem:[%s1469_s7] sm:$0xff]   ;;  %v1053_v37 = vld [vmem:[%s1464_s2 + $0x8] sm:$0xff]  }
 0x3ea   :  { %v475_v46 = vsel %vm468_vm4, %v466_v43, %v440_v33 }
 0x3eb   :  { %v491_v54 = vmul.f32 %v483_v49, %v475_v46 }
 0x3ec   :  { %v434_v38 = vpop.permute.xlu1 %433  ;;  %v436_v39 = vpop.permute.xlu0 %435 }
 0x3ed   :  { %v473_v0 = vsel %vm468_vm4, %v464_v60, %v436_v39  ;;  %v472_v16 = vsel %vm468_vm4, %v463_v12, %v434_v38  ;;  %v1054_v38 = vld [vmem:[%s1464_s2] sm:$0xff]  }
 0x3ee   :  { %v489_v13 = vmul.f32 %v481_v63, %v473_v0  ;;  %v488_v24 = vmul.f32 %v480_v15, %v472_v16 }
 0x3f0   :  { %v382_v40 = vpop.permute.xlu1 %381  ;;  %v394_v41 = vpop.permute.xlu0 %393 }
 0x3f1   :  { %v458_v47 = vsel %vm87_vm0, %v959_v26, %v394_v41  ;;  %v452_v26 = vsel %vm87_vm0, %v1275_v23, %v382_v40 }
 0x3f4   :  { %v418_v44 = vpop.permute.xlu1 %417  ;;  %v432_v45 = vpop.permute.xlu0 %431 }
 0x3f5   :  { %v467_v50 = vsel %vm459_vm3, %v458_v47, %v418_v44  ;;  %v471_v10 = vsel %vm468_vm4, %v462_v5, %v432_v45  ;;  %v553_v44 = vlaneseq  ;;  %v1390_v47 = vld [vmem:[%s1467_s5] sm:$0xff]  ;;  %v1055_v5 = vld [vmem:[%s1465_s3 + $0x8] sm:$0xff]  }
 0x3f6   :  { %v487_v17 = vmul.f32 %v479_v9, %v471_v10  ;;  %981 = vmatpush3.bf16.msra.mxu0 %v1055_v5 }
 0x3f7   :  { %v1384_v45 = vshrl.u32 %v553_v44, 7  ;;  %982 = vmatprep.subr.bf16.mxu0 %v1133_v27 }
 0x3f8   :  { %v442_v51 = vpop.permute.xlu1 %441  ;;  %v380_v55 = vpop.permute.xlu0 %379  ;;  %v494_v32 = vpack.c.bf16 %v488_v24, %v487_v17 }
 0x3f9   :  { %v476_v52 = vsel %vm468_vm4, %v467_v50, %v442_v51  ;;  %v451_v22 = vsel %vm87_vm0, %v1267_v21, %v380_v55  ;;  %v555_v46 = vsub.s32 0, %v1384_v45  ;;  %v651_v16 = vsub.s32 2, %v1384_v45 }
 0x3fa   :  { %v492_v53 = vmul.f32 %v484_v48, %v476_v52 }
 0x3fb   :  { %v556_v48 = vrot.slane %v1390_v47, %v555_v46 }
 0x3fc   :  { %v390_v56 = vpop.permute.xlu1 %389  ;;  %v496_v57 = vpack.c.bf16 %v492_v53, %v491_v54  ;;  %v404_v61 = vpop.permute.xlu0 %403 }
 0x3fd   :  { %v456_v1 = vsel %vm87_vm0, %v359_v28, %v390_v56  ;;  %v460_v25 = vsel %vm459_vm3, %v451_v22, %v404_v61  ;;  %v477_v28 = vld [vmem:[%s1470_s8] sm:$0xff] }
 0x3fe   :  { %961 = vmatpush3.bf16.msra.mxu1 %v496_v57 }
 0x3ff   :  { %962 = vmatprep.subr.bf16.mxu1 %v1133_v27 }
 0x400   :  { %v414_v58 = vpop.permute.xlu1 %413  ;;  %v428_v18 = vpop.permute.xlu0 %427 }
 0x401   :  { %v465_v6 = vsel %vm459_vm3, %v456_v1, %v414_v58  ;;  %v469_v29 = vsel %vm468_vm4, %v460_v25, %v428_v18 }
 0x402   :  { %v485_v34 = vmul.f32 %v477_v28, %v469_v29  ;;  %v1057_v29 = vld [vmem:[%s1466_s4 + $0x38] sm:$0xff]  }
 0x404   :  { %v438_v7 = vpop.permute.xlu1 %437 }
 0x405   :  { %v474_v11 = vsel %vm468_vm4, %v465_v6, %v438_v7  ;;  %v1056_v6 = vld [vmem:[%s1465_s3] sm:$0xff]  }
 0x406   :  { %v490_v14 = vmul.f32 %v482_v3, %v474_v11  ;;  %983 = vmatpush3.bf16.msra.mxu0 %v1056_v6 }
 0x408   :  { %v406_v19 = vpop.permute.xlu1 %405  ;;  %v495_v20 = vpack.c.bf16 %v490_v14, %v489_v13  ;;  %v645_v13 = vsub.s32 1, %v1384_v45 }
 0x409   :  { %v461_v21 = vsel %vm459_vm3, %v452_v26, %v406_v19  ;;  %v652_v19 = vrot.slane %v1390_v47, %v651_v16 }
 0x40a   :  { %963 = vmatpush3.bf16.msra.mxu1 %v495_v20  ;;  %v646_v15 = vrot.slane %v1390_v47, %v645_v13 }
 0x40b   :  { %964 = vmatprep.subr.bf16.mxu1 %v1133_v27 }
 0x40c   :  { %v430_v31 = vpop.permute.xlu1 %429 }
 0x40d   :  { %v470_v33 = vsel %vm468_vm4, %v461_v21, %v430_v31  ;;  %v1059_v21 = vld [vmem:[%s1466_s4 + $0x28] sm:$0xff]   ;;  %v1060_v31 = vld [vmem:[%s1466_s4 + $0x20] sm:$0xff]  }
 0x40e   :  { %v486_v23 = vmul.f32 %v478_v30, %v470_v33  ;;  %965 = vmatpush3.bf16.msra.mxu1 %v494_v32  ;;  %v1058_v30 = vld [vmem:[%s1466_s4 + $0x30] sm:$0xff]   ;;  %v1061_v32 = vld [vmem:[%s1466_s4 + $0x18] sm:$0xff]  }
 0x40f   :  { %966 = vmatprep.subr.bf16.mxu1 %v1133_v27  ;;  %v1062_v33 = vld [vmem:[%s1466_s4 + $0x10] sm:$0xff]  }
 0x410   :  { %v493_v35 = vpack.c.bf16 %v486_v23, %v485_v34  ;;  %v1063_v34 = vld [vmem:[%s1466_s4 + $0x8] sm:$0xff]   ;;  %v1064_v23 = vld [vmem:[%s1466_s4] sm:$0xff]   ;;  %s1135_s4 = smov [#allocation2]  }
 0x411   :  { %s857_s29 = sshll.u32 %s1135_s4, 4  ;;  %s858_s29 = int_to_ptr.vmem [resolvable:$true] %s857_s29 }
 0x412   :  { %967 = vmatpush3.bf16.msra.mxu1 %v493_v35  ;;  %v662_v35 = vsub.s32 4, %v1384_v45  ;;  %s1105_s30 = scalar_lea.vmem %s858_s29, 256  ;;  %p1110_p1 = scmp.lt.s32.totalorder %s858_s29, %s858_s29 }
 0x413   :  { %972 = vmatprep.subr.bf16.mxu1 %v1133_v27  ;;  %p1106_p0 = scmp.ne.s32.totalorder %s858_s29, %s1105_s30  ;;  %p1111_p2 = scmp.lt.s32.totalorder %s1105_s30, %s1105_s30 }
 0x415   :  { %969 = vmatmul.mubr.msk.bf16.vlgmr.msra.gmra.mxu1 %vm201_vm1, %v1052_v36  ;;  %v663_v36 = vrot.slane %v1390_v47, %v662_v35  ;;  %p1112_p3 = por %p1111_p2, %p1110_p1 }
 0x416   :  { %973 = vmatpush3.bf16.msra.mxu1 %v1053_v37  ;;  %976 = vmatprep.mubr.msk.bf16.mxu1 %vm1134_vm2, %v1133_v27 }
 0x417   :  { %974 = vmatprep.subr.bf16.mxu1 %v1133_v27  ;;  %p1113_p4 = pnand %p1112_p3, %p1106_p0 }
 0x41a   :  { %975 = vmatpush3.bf16.msra.mxu1 %v1054_v38 }
 0x41b   :  { %988 = vmatprep.subr.bf16.mxu1 %v1133_v27 }
 0x4d5   :  { %v541_v39 = vpop.f32.mrf.mxu1 }
 0x4d7   :  { %v970_v40 = vpop.f32.mrf.mxu1 }
 0x4d9   :  { %v544_v41 = vpop.f32.mrf.mxu1 }
 0x4da   :  { %v548_v42 = vpack.c.bf16 %v544_v41, %v541_v39 }
 0x4db   :  { %v971_v43 = vpop.f32.mrf.mxu1 }
 0x4dc   :  { %977 = vmatmul.mubr.msk.bf16.vlgmr.msra.gmra.mxu1 %vm569_vm5, %v548_v42 }
 0x4dd   :  { %1004 = vmatprep.mubr.msk.bf16.mxu1 %vm1134_vm2, %v1133_v27  ;;  %989 = vmatpush3.bf16.msra.mxu1 %v1057_v29 }
 0x4de   :  { %990 = vmatprep.subr.bf16.mxu1 %v1133_v27 }
 0x4e1   :  { %991 = vmatpush3.bf16.msra.mxu1 %v1058_v30 }
 0x4e2   :  { %992 = vmatprep.subr.bf16.mxu1 %v1133_v27 }
 0x4e5   :  { %993 = vmatpush3.bf16.msra.mxu1 %v1059_v21 }
 0x4e6   :  { %994 = vmatprep.subr.bf16.mxu1 %v1133_v27 }
 0x4e9   :  { %995 = vmatpush3.bf16.msra.mxu1 %v1060_v31 }
 0x4ea   :  { %996 = vmatprep.subr.bf16.mxu1 %v1133_v27 }
 0x4ed   :  { %997 = vmatpush3.bf16.msra.mxu1 %v1061_v32 }
 0x4ee   :  { %998 = vmatprep.subr.bf16.mxu1 %v1133_v27 }
 0x4f1   :  { %999 = vmatpush3.bf16.msra.mxu1 %v1062_v33 }
 0x4f2   :  { %1000 = vmatprep.subr.bf16.mxu1 %v1133_v27 }
 0x4f5   :  { %1001 = vmatpush3.bf16.msra.mxu1 %v1063_v34 }
 0x4f6   :  { %1002 = vmatprep.subr.bf16.mxu1 %v1133_v27 }
 0x4f9   :  { %1003 = vmatpush3.bf16.msra.mxu1 %v1064_v23 }
 0x59c   :  { %v607_v49 = vpop.f32.mrf.mxu1 }
 0x59d   :  { %v608_v50 = vadd.f32 %v607_v49, %v556_v48 }
 0x59e   :  { %v978_v51 = vpop.f32.mrf.mxu1 }
 0x59f   :  { %v1394_v52 = vadd.f32 %v608_v50, %v1196_v2 }
 0x5a0   :  { %v610_v53 = vpop.f32.mrf.mxu1 }
 0x5a1   :  { %v611_v54 = vadd.f32 %v610_v53, %v556_v48  ;;  %v616_v55 = vsel %vm569_vm5, %v1394_v52, 0.0 }
 0x5a2   :  { %617 = vadd.xlane.f32.xlu0 %v616_v55  ;;  %v979_v56 = vpop.f32.mrf.mxu1 }
 0x5a3   :  { %v1399_v57 = vadd.f32 %v611_v54, %v1201_v4 }
 0x5a5   :  { %v619_v58 = vsel %vm569_vm5, %v1399_v57, 0.0 }
 0x5a6   :  { %620 = vadd.xlane.f32.xlu1 %v619_v58 }
 0x62b   :  { %v618_v59 = vpop.xlane.xlu0 %617 }
 0x62c   :  { %v623_v60 = vmul.f32 0.03125, %v618_v59 }
 0x62e   :  { %v625_v61 = vsub.f32 %v1394_v52, %v623_v60 }
 0x62f   :  { %v621_v2 = vpop.xlane.xlu1 %620 }
 0x630   :  { %v624_v62 = vmul.f32 0.03125, %v621_v2  ;;  %v627_v63 = vmul.f32 %v625_v61, %v625_v61 }
 0x632   :  { %v626_v0 = vsub.f32 %v1399_v57, %v624_v62  ;;  %v629_v1 = vsel %vm569_vm5, %v627_v63, 0.0 }
 0x633   :  { %630 = vadd.xlane.f32.xlu0 %v629_v1 }
 0x634   :  { %v628_v3 = vmul.f32 %v626_v0, %v626_v0 }
 0x636   :  { %v632_v4 = vsel %vm569_vm5, %v628_v3, 0.0 }
 0x637   :  { %633 = vadd.xlane.f32.xlu0 %v632_v4 }
 0x6bc   :  { %v631_v7 = vpop.xlane.xlu0 %630 }
 0x6bd   :  { %v635_v8 = vmul.f32 0.03125, %v631_v7 }
 0x6bf   :  { %v637_v9 = vadd.f32 1e-05, %v635_v8 }
 0x6c0   :  { %v634_v10 = vpop.xlane.xlu0 %633 }
 0x6c1   :  { %1097 = vrsqrt.f32 %v637_v9  ;;  %v636_v11 = vmul.f32 0.03125, %v634_v10 }
 0x6c3   :  { %v638_v12 = vadd.f32 1e-05, %v636_v11 }
 0x6c5   :  { %1099 = vrsqrt.f32 %v638_v12 }
 0x6ce   :  { %v1098_v14 = vpop.eup %1097 }
 0x6cf   :  { %v641_v17 = vmul.f32 %v1098_v14, %v625_v61 }
 0x6d1   :  { %v647_v20 = vmul.f32 %v646_v15, %v641_v17 }
 0x6d2   :  { %v1100_v18 = vpop.eup %1099 }
 0x6d3   :  { %v642_v22 = vmul.f32 %v1100_v18, %v626_v0  ;;  %v653_v26 = vadd.f32 %v652_v19, %v647_v20  ;;  %v757_v0 = vsub.s32 3, %v1384_v45 }
 0x6d5   :  { %v648_v24 = vmul.f32 %v646_v15, %v642_v22  ;;  %v758_v1 = vrot.slane %v1390_v47, %v757_v0 }
 0x6d7   :  { %v654_v25 = vadd.f32 %v652_v19, %v648_v24 }
 0x6d9   :  { %v655_v28 = vpack.c.bf16 %v654_v25, %v653_v26 }
 0x6db   :  { %985 = vmatmul.mubr.msk.bf16.vlgmr.msra.gmra.mxu0 %vm569_vm5, %v655_v28 }
 0x79b   :  { %v713_v37 = vpop.f32.mrf.mxu0 }
 0x79c   :  { %v714_v38 = vadd.f32 %v713_v37, %v663_v36 }
 0x79d   :  { %v986_v39 = vpop.f32.mrf.mxu0 }
 0x79e   :  { %v722_v40 = vmul.f32 0.044715, %v714_v38  ;;  %v720_v59 = vmul.f32 0.5, %v714_v38 }
 0x79f   :  { %v716_v41 = vpop.f32.mrf.mxu0 }
 0x7a0   :  { %v724_v42 = vmul.f32 %v722_v40, %v714_v38  ;;  %v717_v43 = vadd.f32 %v716_v41, %v663_v36 }
 0x7a1   :  { %v987_v44 = vpop.f32.mrf.mxu0 }
 0x7a2   :  { %v726_v46 = vmul.f32 %v724_v42, %v714_v38  ;;  %v723_v48 = vmul.f32 0.044715, %v717_v43  ;;  %v721_v60 = vmul.f32 0.5, %v717_v43 }
 0x7a4   :  { %v728_v49 = vadd.f32 %v726_v46, %v714_v38  ;;  %v725_v50 = vmul.f32 %v723_v48, %v717_v43 }
 0x7a6   :  { %v730_v51 = vmul.f32 0.7978846, %v728_v49  ;;  %v727_v53 = vmul.f32 %v725_v50, %v717_v43 }
 0x7a8   :  { %1101 = vtanh.f32 %v730_v51  ;;  %v729_v27 = vadd.f32 %v727_v53, %v717_v43 }
 0x7aa   :  { %v731_v54 = vmul.f32 0.7978846, %v729_v27 }
 0x7ac   :  { %1103 = vtanh.f32 %v731_v54 }
 0x7b5   :  { %v1102_v55 = vpop.eup %1101 }
 0x7b6   :  { %v734_v56 = vadd.f32 1.0, %v1102_v55 }
 0x7b8   :  { %v736_v2 = vmul.f32 %v734_v56, %v720_v59 }
 0x7b9   :  { %v1104_v58 = vpop.eup %1103 }
 0x7ba   :  { %v735_v61 = vadd.f32 1.0, %v1104_v58 }
 0x7bc   :  { %v737_v62 = vmul.f32 %v735_v61, %v721_v60 }
 0x7be   :  { %v738_v63 = vpack.c.bf16 %v737_v62, %v736_v2 }
 0x7c0   :  { %1005 = vmatmul.mubr.bf16.vlgmr.msra.gmra.mxu1 %v738_v63 }
 0x880   :  { %v841_v3 = vpop.f32.mrf.mxu1 }
 0x881   :  { %v842_v4 = vadd.f32 %v841_v3, %v758_v1 }
 0x882   :  { %v1006_v5 = vpop.f32.mrf.mxu1 }
 0x883   :  { %v848_v6 = vadd.f32 %v842_v4, %v1394_v52 }
 0x884   :  { %v844_v7 = vpop.f32.mrf.mxu1 }
 0x885   :  { %850 = vst.msk [vmem:[#allocation2] sm:$0xff] %vm569_vm5, %v848_v6  ;;  %v845_v8 = vadd.f32 %v844_v7, %v758_v1 }
 0x886   :  { %v1007_v9 = vpop.f32.mrf.mxu1 }
 0x887   :  { %v849_v10 = vadd.f32 %v845_v8, %v1399_v57 }
 0x889   :  { %851 = vst.msk [vmem:[#allocation2 + $0x8] sm:$0xff] %vm569_vm5, %v849_v10 }
 0x88a   :  { %1116 = shalt.err (!%p1113_p4)
}
 0x88b   :  { %s1136_s8 = smov 128  }
 0x88c   :  { %863 = dma.vmem_to_hbm [thread:$0]  %s858_s29, 256, %s1471_s9, [#allocation3], %s1136_s8, %s1136_s8, %s1130_s6  }
 0x88d   :  { %1125 = dma.done.wait [#allocation3], 256  }
 0x88e   :  { %1126 = vsyncadd [#allocation3], 4294967040 }
 0x88f   :  { %867 = vsyncpa [#allocation3], 1 }

</bundles_post_ra>
